<compile_context>
chip_gen: v7x
topology: tpu7x:2x2x1
jax: 0.10.0
libtpu: 0.0.40
codegen_flags: <defaults>
</compile_context>

<pallas_src>
import functools

import jax
import jax.numpy as jnp
from jax import lax
from jax.experimental import pallas as pl
from jax.experimental.pallas import tpu as pltpu


def _round_up(v, m):
    return (v + m - 1) // m * m


# ---------------------------------------------------------------------------
# Fused single-pass kernel: pool -> gate -> scale on one (tb, C, HW) block.
# ---------------------------------------------------------------------------
def _fused_kernel(x_ref, w1t_ref, w2t_ref, o_ref, *, inv_hw):
    x = x_ref[...]                                             # (tb, C, HW)
    # Global average pool; f32 accumulation inside the reduce (no full-block
    # f32 temporary for bf16 inputs).
    pooled = jnp.sum(x, axis=-1, dtype=jnp.float32) * inv_hw   # (tb, C)
    # 1x1 conv #1 (squeeze) + ReLU, row-vector form (weights pre-transposed).
    hidden = jnp.maximum(
        jnp.dot(pooled, w1t_ref[...], preferred_element_type=jnp.float32), 0.0)
    # 1x1 conv #2 (excite) + sigmoid.
    gate = jax.nn.sigmoid(
        jnp.dot(hidden, w2t_ref[...], preferred_element_type=jnp.float32))
    # Gate cast to x.dtype before the multiply (for bf16 inputs this quantizes
    # the sigmoid; negligible vs an f32-master run).
    o_ref[...] = x * gate[:, :, None].astype(x.dtype)


# ---------------------------------------------------------------------------
# Chunked fallback: spatial-chunk pooling (accumulator) + spatial-chunk scale.
# Used only when one batch element does not fit the VMEM block budget.
# ---------------------------------------------------------------------------
def _pool_kernel(x_ref, sum_ref, *, chunk, hw):
    k = pl.program_id(1)

    @pl.when(k == 0)
    def _():
        sum_ref[...] = jnp.zeros_like(sum_ref)

    x = x_ref[...]                                             # (1, C, chunk)
    if hw % chunk != 0:
        # Ragged last chunk: OOB lanes hold stale data; mask them out of the sum.
        valid = hw - k * chunk
        mask = lax.broadcasted_iota(jnp.int32, x.shape, 2) < valid
        x = jnp.where(mask, x, jnp.zeros_like(x))
    sum_ref[...] += jnp.sum(x, axis=-1, keepdims=True, dtype=jnp.float32)


def _scale_kernel(gate_ref, x_ref, o_ref):
    x = x_ref[...]                                             # (1, C, chunk)
    o_ref[...] = x * gate_ref[...].astype(x.dtype)             # (1, C, 1) bcast


# ---------------------------------------------------------------------------
# Wrapper
# ---------------------------------------------------------------------------
def channel_attention(x_nchw, w1, w2, *,
                      target_block_bytes=8 * 1024 * 1024,
                      vmem_limit_bytes=48 * 1024 * 1024):
    """x_nchw: (B,C,H,W); w1: (R,C) [Conv2d(C->R,1)]; w2: (C,R) [Conv2d(R->C,1)]."""
    B, C, H, W = x_nchw.shape
    R = w1.shape[0]
    HW = H * W
    itemsize = jnp.dtype(x_nchw.dtype).itemsize
    sub = 32 // itemsize                         # sublane packing: 8/16/32
    # VMEM footprint of one batch element once laid out in (sublane, lane) tiles.
    padded_batch_bytes = _round_up(C, sub) * _round_up(HW, 128) * itemsize

    # Free reshape (contiguous); no padding, no trailing slice anywhere.
    x_flat = x_nchw.reshape(B, C, HW)
    w1t = w1.T                                   # (C, R)
    w2t = w2.T                                   # (R, C)

    # 2x double-buffered input + 2x output blocks must fit under the scoped
    # VMEM limit; leave ~1 MiB headroom for weights / misc.
    budget = min(target_block_bytes, max((vmem_limit_bytes - (1 << 20)) // 4, 1))

    cost = pl.CostEstimate(
        flops=3 * B * C * HW + 4 * B * C * R,
        transcendentals=B * C,
        bytes_accessed=2 * B * C * HW * itemsize + 2 * C * R * 4,
    )

    if padded_batch_bytes <= budget:
        # ---------------- fused single-pass path ----------------
        fitting = [d for d in range(1, B + 1)
                   if B % d == 0 and d * padded_batch_bytes <= budget]
        tb = max(fitting)
        best_bytes = tb * padded_batch_bytes
        # Prefer >=4 grid steps (2 pipelined steps per v7x TensorCore), else
        # >=2, as long as the block stays at least half as large.
        for steps in (4, 2):
            cands = [d for d in fitting if B // d >= steps]
            if cands and max(cands) * padded_batch_bytes * 2 >= best_bytes:
                tb = max(cands)
                break

        kernel = functools.partial(_fused_kernel, inv_hw=1.0 / HW)
        out_flat = pl.pallas_call(
            kernel,
            out_shape=jax.ShapeDtypeStruct((B, C, HW), x_flat.dtype),
            grid_spec=pltpu.PrefetchScalarGridSpec(
                num_scalar_prefetch=0,
                grid=(B // tb,),
                in_specs=[
                    pl.BlockSpec((tb, C, HW), lambda b: (b, 0, 0)),
                    pl.BlockSpec((C, R), lambda b: (0, 0)),
                    pl.BlockSpec((R, C), lambda b: (0, 0)),
                ],
                out_specs=pl.BlockSpec((tb, C, HW), lambda b: (b, 0, 0)),
            ),
            compiler_params=pltpu.CompilerParams(
                # NOTE: pltpu.CORE_PARALLEL is worth a sweep on v7x.
                dimension_semantics=("parallel",),
                vmem_limit_bytes=vmem_limit_bytes,
            ),
            cost_estimate=cost,
        )(x_flat, w1t, w2t)
        return out_flat.reshape(B, C, H, W)

    # ---------------- chunked two-kernel fallback ----------------
    # Spatial chunk: multiple of 128 lanes sized to the block budget.
    chunk = max(128, (budget // (_round_up(C, sub) * itemsize)) // 128 * 128)
    n_chunks = (HW + chunk - 1) // chunk

    pool_kernel = functools.partial(_pool_kernel, chunk=chunk, hw=HW)
    sums = pl.pallas_call(
        pool_kernel,
        out_shape=jax.ShapeDtypeStruct((B, C, 1), jnp.float32),
        grid_spec=pltpu.PrefetchScalarGridSpec(
            num_scalar_prefetch=0,
            grid=(B, n_chunks),
            in_specs=[pl.BlockSpec((1, C, chunk), lambda b, k: (b, 0, k))],
            out_specs=pl.BlockSpec((1, C, 1), lambda b, k: (b, 0, 0)),
        ),
        compiler_params=pltpu.CompilerParams(
            dimension_semantics=("parallel", "arbitrary"),
            vmem_limit_bytes=vmem_limit_bytes,
        ),
    )(x_flat)

    # Tiny gate math (B*C elements) — plain JAX is cheapest here.
    pooled = sums[..., 0] * (1.0 / HW)                               # (B, C)
    hidden = jnp.maximum(pooled @ w1t.astype(jnp.float32), 0.0)      # (B, R)
    gate = jax.nn.sigmoid(hidden @ w2t.astype(jnp.float32))          # (B, C)
    gate = gate[..., None]                                           # (B, C, 1)

    out_flat = pl.pallas_call(
        _scale_kernel,
        out_shape=jax.ShapeDtypeStruct((B, C, HW), x_flat.dtype),
        grid_spec=pltpu.PrefetchScalarGridSpec(
            num_scalar_prefetch=0,
            grid=(B, n_chunks),
            in_specs=[
                pl.BlockSpec((1, C, 1), lambda b, k: (b, 0, 0)),
                pl.BlockSpec((1, C, chunk), lambda b, k: (b, 0, k)),
            ],
            out_specs=pl.BlockSpec((1, C, chunk), lambda b, k: (b, 0, k)),
        ),
        compiler_params=pltpu.CompilerParams(
            dimension_semantics=("parallel", "parallel"),
            vmem_limit_bytes=vmem_limit_bytes,
        ),
        cost_estimate=cost,
    )(gate, x_flat)
    return out_flat.reshape(B, C, H, W)


def reference_channel_attention(x, w1, w2):
    """Pure-JAX reference matching the PyTorch module."""
    pooled = jnp.mean(x, axis=(2, 3))                          # (B, C)
    hidden = jnp.maximum(pooled @ w1.T, 0.0)                   # (B, R)
    gate = jax.nn.sigmoid(hidden @ w2.T)                       # (B, C)
    return x * gate[:, :, None, None]


if __name__ == "__main__":
    key = jax.random.PRNGKey(0)
    B, C, H, W = 2, 4, 16, 16
    reduction = 16
    R = max(C // reduction, 8)                                 # = 8

    kx, k1, k2 = jax.random.split(key, 3)
    x = jax.random.normal(kx, (B, C, H, W), dtype=jnp.float32)
    # Conv2d(C, R, 1, bias=False).weight is (R, C, 1, 1) -> use (R, C)
    w1 = jax.random.normal(k1, (R, C), dtype=jnp.float32) * 0.1
    # Conv2d(R, C, 1, bias=False).weight is (C, R, 1, 1) -> use (C, R)
    w2 = jax.random.normal(k2, (C, R), dtype=jnp.float32) * 0.1

    out = channel_attention(x, w1, w2)
    jax.block_until_ready(out)
    ref = reference_channel_attention(x, w1, w2)
    assert out.shape == (B, C, H, W)
    assert jnp.allclose(out, ref, atol=1e-5, rtol=1e-5), "fused path mismatch"

    # Spatial size not a multiple of 128 -> exercises the unpadded ragged lane
    # tile in the fused path (no wrapper pad / slice).
    x2 = jax.random.normal(kx, (3, C, 6, 6), dtype=jnp.float32)
    out2 = channel_attention(x2, w1, w2)
    jax.block_until_ready(out2)
    assert jnp.allclose(out2, reference_channel_attention(x2, w1, w2),
                        atol=1e-5, rtol=1e-5), "fused ragged-HW mismatch"

    # Force the chunked pool+scale fallback (tiny budget); 15x20 = 300 gives a
    # ragged last spatial chunk (44 of 128) to exercise the masked reduction.
    x3 = jax.random.normal(kx, (2, C, 15, 20), dtype=jnp.float32)
    out3 = channel_attention(x3, w1, w2, target_block_bytes=4096)
    jax.block_until_ready(out3)
    assert jnp.allclose(out3, reference_channel_attention(x3, w1, w2),
                        atol=1e-5, rtol=1e-5), "chunked fallback mismatch"

    print("KERNEL_OK")
</pallas_src>

<mosaic_0001>
module attributes {stable_mosaic.version = 11 : i64} {
  func.func @_fused_kernel(%arg0: i32, %arg1: memref<1x4x256xf32, #tpu.memory_space<vmem>>, %arg2: memref<4x8xf32, #tpu.memory_space<vmem>>, %arg3: memref<8x4xf32, #tpu.memory_space<vmem>>, %arg4: memref<1x4x256xf32, #tpu.memory_space<vmem>>) attributes {dimension_semantics = [#tpu.dimension_semantics<parallel>], iteration_bounds = array<i64: 2>, scalar_prefetch = 0 : i64, scratch_operands = 0 : i64, tpu.core_type = #tpu.core_type<tc>, window_params = [{transform_indices = @transform_0, window_bounds = array<i64: 1, 4, 256>}, {pipeline_mode = #tpu.pipeline_mode<synchronous>, transform_indices = @transform_1, window_bounds = array<i64: 4, 8>}, {pipeline_mode = #tpu.pipeline_mode<synchronous>, transform_indices = @transform_2, window_bounds = array<i64: 8, 4>}, {transform_indices = @transform_3, window_bounds = array<i64: 1, 4, 256>}]} {
    %c0 = arith.constant 0 : index
    %c0_0 = arith.constant 0 : index
    %c0_1 = arith.constant 0 : index
    %0 = vector.load %arg1[%c0, %c0_0, %c0_1] : memref<1x4x256xf32, #tpu.memory_space<vmem>>, vector<1x4x256xf32>
    %cst = arith.constant dense<0.000000e+00> : vector<1x4xf32>
    %1 = vector.multi_reduction <add>, %0, %cst [2] : vector<1x4x256xf32> to vector<1x4xf32>
    %cst_2 = arith.constant 3.906250e-03 : f32
    %2 = vector.broadcast %cst_2 : f32 to vector<1x4xf32>
    %3 = arith.mulf %1, %2 : vector<1x4xf32>
    %c0_3 = arith.constant 0 : index
    %c0_4 = arith.constant 0 : index
    %4 = vector.load %arg2[%c0_3, %c0_4] : memref<4x8xf32, #tpu.memory_space<vmem>>, vector<4x8xf32>
    %cst_5 = arith.constant dense<0.000000e+00> : vector<1x8xf32>
    %5 = tpu.matmul %3, %4, %cst_5 {dimension_numbers = #tpu.dot_dimension_numbers<[1], [0], [0], [1], [0, 0, 1, 1], [], []>} : vector<1x4xf32>, vector<4x8xf32>, vector<1x8xf32> -> vector<1x8xf32>
    %cst_6 = arith.constant 0.000000e+00 : f32
    %6 = vector.broadcast %cst_6 : f32 to vector<1x8xf32>
    %7 = arith.maximumf %5, %6 : vector<1x8xf32>
    %c0_7 = arith.constant 0 : index
    %c0_8 = arith.constant 0 : index
    %8 = vector.load %arg3[%c0_7, %c0_8] : memref<8x4xf32, #tpu.memory_space<vmem>>, vector<8x4xf32>
    %cst_9 = arith.constant dense<0.000000e+00> : vector<1x4xf32>
    %9 = tpu.matmul %7, %8, %cst_9 {dimension_numbers = #tpu.dot_dimension_numbers<[1], [0], [0], [1], [0, 0, 1, 1], [], []>} : vector<1x8xf32>, vector<8x4xf32>, vector<1x4xf32> -> vector<1x4xf32>
    %10 = arith.negf %9 : vector<1x4xf32>
    %11 = math.exp %10 : vector<1x4xf32>
    %cst_10 = arith.constant 1.000000e+00 : f32
    %12 = vector.broadcast %cst_10 : f32 to vector<1x4xf32>
    %13 = arith.addf %12, %11 : vector<1x4xf32>
    %14 = arith.divf %12, %13 : vector<1x4xf32>
    %15 = vector.shape_cast %14 : vector<1x4xf32> to vector<1x4x1xf32>
    %16 = vector.broadcast %15 : vector<1x4x1xf32> to vector<1x4x256xf32>
    %17 = arith.mulf %0, %16 : vector<1x4x256xf32>
    %c0_11 = arith.constant 0 : index
    %c0_12 = arith.constant 0 : index
    %c0_13 = arith.constant 0 : index
    %18 = vector.load %arg4[%c0_11, %c0_12, %c0_13] : memref<1x4x256xf32, #tpu.memory_space<vmem>>, vector<1x4x256xf32>
    tpu.vector_store %arg4[%c0_11, %c0_12, %c0_13], %17 {strides = array<i32>} : memref<1x4x256xf32, #tpu.memory_space<vmem>>, vector<1x4x256xf32>,
    return
  }
  func.func @transform_0(%arg0: i32) -> (i32, i32, i32) {
    %c0_i32 = arith.constant 0 : i32
    %c0_i32_0 = arith.constant 0 : i32
    %c0_i32_1 = arith.constant 0 : i32
    return %arg0, %c0_i32, %c0_i32_0 : i32, i32, i32
  }
  func.func @transform_1(%arg0: i32) -> (i32, i32) {
    %c0_i32 = arith.constant 0 : i32
    %c0_i32_0 = arith.constant 0 : i32
    %c0_i32_1 = arith.constant 0 : i32
    return %c0_i32, %c0_i32_0 : i32, i32
  }
  func.func @transform_2(%arg0: i32) -> (i32, i32) {
    %c0_i32 = arith.constant 0 : i32
    %c0_i32_0 = arith.constant 0 : i32
    %c0_i32_1 = arith.constant 0 : i32
    return %c0_i32, %c0_i32_0 : i32, i32
  }
  func.func @transform_3(%arg0: i32) -> (i32, i32, i32) {
    %c0_i32 = arith.constant 0 : i32
    %c0_i32_0 = arith.constant 0 : i32
    %c0_i32_1 = arith.constant 0 : i32
    return %arg0, %c0_i32, %c0_i32_0 : i32, i32, i32
  }
}

</mosaic_0001>

<bundles_post_ra>
// kernel: tpu_custom_call.1
= control target key start
LH: loop header
LB: loop body
LE: loop exit
PB: predicated region body
PF: predicated region fallthrough
CT: control target
= control target key end

     0   :  { %8 = vsyncpa [#allocation3], 0  ;;  %s849_s0 = inlined_call_operand.hbm [shape: f32[2,4,256], index: 0, kind: input, shape index: {}]   ;;  %s850_s1 = inlined_call_operand.vmem [shape: f32[4,8], index: 1, kind: input, shape index: {}]   ;;  %s851_s2 = inlined_call_operand.vmem [shape: f32[8,4], index: 2, kind: input, shape index: {}]   ;;  %s852_s3 = inlined_call_operand.hbm [shape: f32[2,4,256], index: 3, kind: output, shape index: {}]  }
   0x1   :  { %10 = vsyncpa [#allocation3 + $0x1], 0 }
   0x2   :  { %11 = vsyncpa [#allocation4], 0 }
   0x3   :  { %13 = vsyncpa [#allocation4 + $0x1], 0  ;;  %s678_s12 = smov 0   ;;  %s680_s13 = smov 0  }
   0x4   :  { %s682_s14 = smov 0   ;;  %s684_s15 = smov 0  }
   0x5 LB: > { %s699_s16 = sadd.s32 4294967295, %s651_s15   ;;  %s467_s17 = sadd.s32 4294967294, %s651_s15   ;;  %s651_s15 = sphi %s684_s15, %s867_s15   ;;  %s647_s14 = sphi %s682_s14, %s866_s14   ;;  %s643_s13 = sphi %s680_s13, %s865_s13   ;;  %s639_s12 = sphi %s678_s12, %s864_s12  }
   0x6   : > { %s703_s18 = sadd.s32 1, %s651_s15   ;;  %s26_s19 = sadd.s32 1, %s647_s14 }
   0x7   : > { %s23_s20 = ssub.s32 %s651_s15, %s703_s18  ;;  %p33_p0 = scmp.ne.s32.totalorder %s647_s14, %s643_s13 }
   0x8   : > { %p24_p1 = scmp.eq.s32.totalorder %s23_s20, 0  ;;  %p34_p2 = scmp.eq.s32.totalorder %s651_s15, 0 }
   0x9   : > { %p39_p3 = scmp.ne.s32.totalorder %s643_s13, %s639_s12  ;;  %p40_p4 = scmp.eq.s32.totalorder %s699_s16, 0 }
   0xa   : > { %s715_s21 = scalar_select %p24_p1, %s647_s14, %s26_s19  }
   0xb   : > { %p717_p5 = por %p34_p2, %p33_p0  ;;  %p721_p6 = por %p40_p4, %p39_p3 }
   0xc   : > { %p105_p7 = scmp.eq.s32.totalorder %s699_s16, 1  ;;  %p111_p8 = scmp.eq.s32.totalorder %s467_s17, 1 }
   0xd   : > { %p513_p10 = scmp.lt.s32.totalorder %s651_s15, 2  ;;  %s137_s26 = sand.u32 1, %s647_s14  }
   0xe   : > { %p728_p11 = por %p105_p7, %p33_p0  ;;  %p732_p12 = por %p111_p8, %p39_p3 }
   0xf   : > { %s485_s27 = sshll.u32 %s651_s15, 7  ;;  %s470_s28 = sshll.u32 %s137_s26, 3 }
  0x10   : > { %s856_s24 = scalar_select %p728_p11, 1, 0 }
  0x11   : > { %s857_s25 = scalar_select %p732_p12, 1, 0 }
  0x12   : > { %s741_s4 = scalar_lea.hbm %s849_s0, %s485_s27  ;;  %s141_s5 = scalar_lea.vmem [#allocation2], %s470_s28 }
  0x13   : > { %s149_s6 = sshll.u32 %s141_s5, 4  ;;  %p745_p13 = pnand %p513_p10, %p717_p5  ;;  %s749_s6 = int_to_ptr.vmem [resolvable:$true] %s149_s6 }
  0x14   : > { %s138_s8 = scalar_lea.sflag [#allocation3], %s137_s26  ;;  %s555_s9 = scalar_lea.hbm %s741_s4, 128 }
  0x15   : > { %p556_p2 = scmp.ne.s32.totalorder %s741_s4, %s555_s9  ;;  %p557_p3 = pneg %p745_p13 }
  0x16   : > { %s560_s17 = scalar_lea.hbm %s849_s0, 256  ;;  %p561_p5 = scmp.lt.u32.totalorder %s741_s4, %s849_s0 }
  0x17   : > { %p558_p4 = pnand %p557_p3, %p556_p2  ;;  %p562_p8 = scmp.lt.u32.totalorder %s560_s17, %s555_s9 }
  0x18   : > { %p564_p9 = scmp.lt.u32.totalorder %s555_s9, %s741_s4 }
  0x19   : > { %p559_p7 = pneg %p558_p4  ;;  %p563_p10 = por %p562_p8, %p561_p5 }
  0x1b   : > { %p565_p0 = por %p564_p9, %p563_p10 }
  0x1d   : > { %p566_p1 = pnand %p565_p0, %p559_p7 }
  0x1f   : > { %569 = shalt.err (!%p566_p1)
}
  0x20   : > { %s570_s22 = scalar_lea.vmem %s749_s6, 128  ;;  %s653_s26 = smov [#allocation2]  }
  0x21   : > { %p571_p2 = scmp.ne.s32.totalorder %s749_s6, %s570_s22  ;;  %s575_s27 = sshll.u32 %s653_s26, 4  ;;  %s576_s27 = int_to_ptr.vmem [resolvable:$false] %s575_s27 }
  0x22   : > { %s577_s28 = scalar_lea.vmem %s576_s27, 256  ;;  %p578_p11 = scmp.lt.s32.totalorder %s749_s6, %s576_s27 }
  0x23   : > { %p573_p4 = pnand %p571_p2, %p557_p3  ;;  %p579_p5 = scmp.lt.s32.totalorder %s577_s28, %s570_s22 }
  0x25   : > { %p574_p12 = pneg %p573_p4  ;;  %p580_p8 = por %p579_p5, %p578_p11 }
  0x27   : > { %p581_p9 = pnand %p580_p8, %p574_p12 }
  0x29   : > { %584 = shalt.err (!%p581_p9)
}
  0x2a   : > { %508 = dma.hbm_to_vmem [thread:$0]  (!%p745_p13), %s741_s4, 128, %s749_s6, %s138_s8  }
  0x2b   : > { %p859_p0 = scmp.lt.s32.totalorder %s651_s15, 3  ;;  %p860_p1 = scmp.ge.s32.totalorder %s651_s15, 1 }
  0x2d   : > { %p155_p3 = pnand %p860_p1, %p859_p0 }
  0x2e   : > { %s783_s29 = sand.u32 (!%p155_p3), 1, %s643_s13  }
  0x2f   : > { %158 = sbr.rel (%p155_p3) target bundleno = 794 (0x31a), region = 32  ;;  %s474_s30 = sshll.u32 (!%p155_p3), %s783_s29, 3 }
  0x30   : > { %s161_s5 = scalar_lea.sflag (!%p155_p3), [#allocation3], %s783_s29  ;;  %s164_s7 = scalar_lea.vmem (!%p155_p3), [#allocation2], %s474_s30 }
  0x36   : > { %630 = dma.done.wait (%p721_p6), %s161_s5, 128  }
  0x37   : > { %632 = vsyncadd (%p721_p6), %s161_s5, 4294967168  ;;  %vm191_vm0 = vcmask 1043456   ;;  %v187_v0 = vld [vmem:[%s164_s7] sm:$0xff]  ;;  %v654_v5 = vmov 0.0   ;;  %vm655_vm1 = vmmov 0   ;;  %v200_v7 = vlaneseq  ;;  %s486_s9 = sshll.u32 %s699_s16, 7 }
  0x38   : > { %v189_v1 = vcombine.high %v187_v0, %v187_v0  ;;  %v192_v2 = vsel %vm191_vm0, %v187_v0, 0.0  ;;  %491 = vmatprep.subr.mxu0 %v654_v5  ;;  %v198_v6 = vld [vmem:[%s850_s1] sm:$0xf]  ;;  %496 = vmatprep.subr.mxu1 %v654_v5  ;;  %vm206_vm2 = vcmask 31744   ;;  %vm284_vm3 = vcmask 64512   ;;  %s186_s10 = scalar_lea.vmem [#allocation5], %s474_s30  ;;  %s805_s20 = scalar_lea.hbm %s852_s3, %s486_s9 }
  0x39   : > { %492 = vmatpush3.msk.msra.mxu0 %vm191_vm0, %v198_v6  ;;  %493 = vmatprep.mubr.msk.f32.mxu0 %vm655_vm1, %v654_v5  ;;  %v201_v8 = vand.u32 127, %v200_v7  ;;  %v203_v9 = vshrl.u32 %v200_v7, 7  ;;  %v283_v14 = vld [vmem:[%s851_s2] sm:$0xff]  ;;  %v656_v26 = vmov 839922192   ;;  %s397_s11 = sshll.u32 %s186_s10, 4  ;;  %s807_s11 = int_to_ptr.vmem [resolvable:$true] %s397_s11 }
  0x3a   : > { %v193_v3 = vsel %vm191_vm0, %v189_v1, 0.0  ;;  %498 = vmatprep.mubr.msk.f32.mxu1 %vm655_vm1, %v654_v5  ;;  %497 = vmatpush3.msra.mxu1 %v283_v14  ;;  %v373_v27 = vunpack.c.l.s4 %v656_v26  ;;  %s383_s22 = scalar_lea.sflag [#allocation4], %s783_s29  ;;  %s585_s26 = scalar_lea.vmem %s807_s11, 128 }
  0x3b   : > { %v194_v4 = vadd.f32 %v193_v3, %v192_v2  ;;  %v204_v10 = vsub.s32 %v201_v8, %v203_v9  ;;  %v366_v23 = vsub.s32 0, %v203_v9  ;;  %p586_p6 = scmp.ne.s32.totalorder %s807_s11, %s585_s26  ;;  %p861_p11 = scmp.ne.s32.totalorder %s856_s24, 0 }
  0x3c   : > { %v374_v28 = vunpack.c.0.s8 %v373_v27  ;;  %s657_s16 = smov [#allocation5]  }
  0x3d   : > { %195 = vadd.xlane.f32.xlu0 %v194_v4  ;;  %p587_p12 = pnand %p586_p6, %p861_p11  ;;  %s589_s27 = sshll.u32 %s657_s16, 4  ;;  %s590_s27 = int_to_ptr.vmem [resolvable:$false] %s589_s27 }
  0x3e   : > { %v377_v29 = vsub.s32 %v374_v28, %v203_v9  ;;  %s591_s28 = scalar_lea.vmem %s590_s27, 256  ;;  %p592_p7 = scmp.lt.s32.totalorder %s807_s11, %s590_s27 }
  0x3f   : > { %p588_p13 = pneg %p587_p12  ;;  %p593_p10 = scmp.lt.s32.totalorder %s591_s28, %s585_s26 }
  0x41   : > { %p594_p2 = por %p593_p10, %p592_p7 }
  0x43   : > { %p595_p4 = pnand %p594_p2, %p588_p13 }
  0xca   : > { %v196_v11 = vpop.xlane.xlu0 %195 }
  0xcb   : > { %v197_v12 = vmul.f32 0.00390625, %v196_v11 }
  0xcd   : > { %v205_v13 = vrot.slane %v197_v12, %v204_v10 }
  0xcf   : > { %494 = vmatmul.mubr.msk.f32.vlgmr.msra.gmra.mrb[0].mxu0 %vm206_vm2, %v205_v13 }
 0x1a2   : > { %v278_v15 = vpop.f32.mrb[0].mxu0 }
 0x1a3   : > { %v282_v16 = vmax.f32 %v278_v15, 0.0  ;;  %v495_v17 = vpop.f32.mrb[1].mxu0 }
 0x1a5   : > { %499 = vmatmul.mubr.msk.f32.vlgmr.msra.gmra.mrb[0].mxu1 %vm284_vm3, %v282_v16 }
 0x278   : > { %v354_v18 = vpop.f32.mrb[0].mxu1 }
 0x279   : > { %v479_v19 = vmul.f32 -1.442695, %v354_v18  ;;  %v500_v20 = vpop.f32.mrb[1].mxu1 }
 0x27b   : > { %551 = vpow2.f32 %v479_v19 }
 0x285   : > { %v552_v21 = vpop.eup %551 }
 0x286   : > { %v361_v22 = vadd.f32 1.0, %v552_v21 }
 0x288   : > { %553 = vrcp.f32 %v361_v22 }
 0x292   : > { %v554_v24 = vpop.eup %553 }
 0x293   : > { %v367_v25 = vrot.slane %v554_v24, %v366_v23 }
 0x295   : > { %369 = vbcast.lane.b32.xlu0 %v367_v25, 256 }
 0x307   : > { %v370_v30 = vpop.permute.xlu0 %369 }
 0x308   : > { %v378_v31 = vrot.slane %v370_v30, %v377_v29 }
 0x30a   : > { %v380_v32 = vmul.f32 %v378_v31, %v187_v0 }
 0x30c   : > { %381 = vst [vmem:[%s186_s10] sm:$0xff] %v380_v32 }
 0x30d   : > { %598 = shalt.err (!%p595_p4)
}
 0x30e   : > { %s599_s29 = scalar_lea.hbm %s805_s20, 128  ;;  %s603_s7 = scalar_lea.hbm %s852_s3, 256 }
 0x30f   : > { %p600_p5 = scmp.ne.s32.totalorder %s805_s20, %s599_s29  ;;  %p604_p0 = scmp.lt.u32.totalorder %s805_s20, %s852_s3 }
 0x310   : > { %p605_p1 = scmp.lt.u32.totalorder %s603_s7, %s599_s29  ;;  %p607_p6 = scmp.lt.u32.totalorder %s599_s29, %s805_s20 }
 0x311   : > { %p601_p8 = pnand %p600_p5, %p861_p11 }
 0x312   : > { %p606_p3 = por %p605_p1, %p604_p0 }
 0x313   : > { %p602_p9 = pneg %p601_p8 }
 0x314   : > { %p608_p12 = por %p607_p6, %p606_p3 }
 0x316   : > { %p609_p13 = pnand %p608_p12, %p602_p9 }
 0x318   : > { %612 = shalt.err (!%p609_p13)
}
 0x319   : > { %503 = dma.vmem_to_hbm [thread:$0]  (%p861_p11), %s807_s11, 128, %s805_s20, %s383_s22  }
 0x31a PF: > { %s409_s23 = sand.u32 1, %s639_s12   ;;  %p862_p7 = scmp.ne.s32.totalorder %s857_s25, 0 }
 0x31b   : > { %p863_p10 = scmp.ge.s32.totalorder %s651_s15, 2  ;;  %s410_s8 = scalar_lea.sflag [#allocation4], %s409_s23 }
 0x31d   : > { %p510_p2 = pnand %p863_p10, %p862_p7 }
 0x31f   : > { %634 = dma.done.wait (!%p510_p2), %s410_s8, 128  }
 0x320   : > { %636 = vsyncadd (!%p510_p2), %s410_s8, 4294967168  ;;  %p16_p4 = scmp.ge.s32.totalorder %s703_s18, 4   ;;  %s864_s12 = smov %s643_s13 }
 0x321   : > { %s865_s13 = smov %s647_s14  ;;  %s866_s14 = smov %s715_s21 }
 0x322   : > { %s867_s15 = smov %s703_s18  ;;  %18 = sbr.rel (!%p16_p4) target bundleno = 5 (0x5), region = 77 }
 0x329   :  { %415 = vsyncpa [#allocation3], 1 }
 0x32a   :  { %417 = vsyncpa [#allocation3 + $0x1], 1 }
 0x32b   :  { %418 = vsyncpa [#allocation4], 1 }
 0x32c   :  { %420 = vsyncpa [#allocation4 + $0x1], 1 }

</bundles_post_ra>
